<compile_context>
chip_gen: v6e
topology: v6e:2x2x1
jax: 0.10.0
libtpu: 0.0.40
codegen_flags: <defaults>
</compile_context>

<pallas_src>
import functools

import jax
import jax.numpy as jnp
from jax.experimental import pallas as pl
from jax.experimental.pallas import tpu as pltpu

_LANE = 128
_SUBLANE = 8


def _round_up(n, m):
    return -(-n // m) * m


def _sigmoid_eup(x):
    # sigmoid(x) == 0.5 * (tanh(x/2) + 1): one EUP transcendental, no VALU divide.
    return 0.5 * (jnp.tanh(0.5 * x) + 1.0)


def mlp_kernel(x_ref, w1_ref, b1_ref, w2_ref, b2_ref, w3_ref, b3_ref, o_ref):
    # fc1 + sigmoid (bf16 MXU operands, f32 accumulate; activation math stays f32 so the
    # same kernel is correct on v5e).
    h1 = jnp.dot(x_ref[...].astype(jnp.bfloat16), w1_ref[...],
                 preferred_element_type=jnp.float32)
    h1 = _sigmoid_eup(h1 + b1_ref[...])
    # fc2 + sigmoid
    h2 = jnp.dot(h1.astype(jnp.bfloat16), w2_ref[...],
                 preferred_element_type=jnp.float32)
    h2 = _sigmoid_eup(h2 + b2_ref[...])
    # fc3 (logits, no activation)
    out = jnp.dot(h2.astype(jnp.bfloat16), w3_ref[...],
                  preferred_element_type=jnp.float32) + b3_ref[...]
    o_ref[...] = out.astype(o_ref.dtype)


def _vmem_capacity_bytes():
    try:
        return int(pltpu.get_tpu_info().vmem_capacity_bytes)
    except Exception:
        return 64 << 20  # conservative fallback: v7x per-TensorCore VMEM


def _pick_bm(B, block_bm):
    """MXU-shaped batch tile, minimal padding waste, >=2 grid steps when possible."""
    if B <= _LANE:
        return _round_up(B, _SUBLANE)
    cap = min(_round_up(block_bm, _LANE), _round_up(B, _LANE))
    best_bm, best_waste = _LANE, _round_up(B, _LANE) - B
    cand = _LANE
    while cand <= cap:
        waste = _round_up(B, cand) - B
        if waste < best_waste or (waste == best_waste and cand > best_bm):
            best_bm, best_waste = cand, waste
        cand *= 2
    bm = best_bm
    # >=2 grid steps so dimension_semantics=("parallel",) can shard across both
    # TensorCores on v7x for mid-size batches (e.g. B=256 -> bm=128, grid=(2,)).
    while bm > _LANE and -(-B // bm) < 2:
        bm //= 2
    return bm


def _fit_bm_to_vmem(bm, in_p, hid_p, nc_p, budget):
    # Single-buffered residents: three bf16 weight matrices + f32 biases.
    weight_bytes = (in_p * hid_p + hid_p * hid_p + hid_p * nc_p) * 2 \
                   + (2 * hid_p + nc_p) * 4
    act_bytes = lambda m: 2 * m * (in_p + nc_p) * 4  # double-buffered x / out tiles
    while bm > _SUBLANE and weight_bytes + act_bytes(bm) > budget:
        bm = max(_SUBLANE, _round_up(bm // 2, _SUBLANE))
    # TODO(synk): if weight_bytes alone exceeds the budget (hidden_size ~>4K on v7x's
    # 64 MiB VMEM), tile the hid_p reduction over an extra grid axis with an f32
    # accumulator scratch instead of keeping every weight matrix VMEM-resident.
    return bm, weight_bytes + act_bytes(bm)


def prepare_params(params):
    """Pad to lane-dense shapes and cast weights to bf16 ONCE (hoisted out of the
    per-call path). Returns (padded_arrays, static_dims)."""
    w1, b1, w2, b2, w3, b3 = params
    in_sz, hid = int(w1.shape[0]), int(w1.shape[1])
    nc = int(w3.shape[1])
    in_p, hid_p, nc_p = (_round_up(d, _LANE) for d in (in_sz, hid, nc))

    def pad2(a, r, c, dt):
        return jnp.zeros((r, c), dt).at[: a.shape[0], : a.shape[1]].set(a.astype(dt))

    padded = (
        pad2(w1, in_p, hid_p, jnp.bfloat16), pad2(b1, 1, hid_p, jnp.float32),
        pad2(w2, hid_p, hid_p, jnp.bfloat16), pad2(b2, 1, hid_p, jnp.float32),
        pad2(w3, hid_p, nc_p, jnp.bfloat16), pad2(b3, 1, nc_p, jnp.float32),
    )
    dims = (in_sz, hid, nc, in_p, hid_p, nc_p)
    return padded, dims


@functools.partial(jax.jit, static_argnames=("dims", "block_bm", "single_buffer"))
def _mlp_forward(x, padded, *, dims, block_bm, single_buffer):
    w1p, b1p, w2p, b2p, w3p, b3p = padded
    in_sz, hid, nc, in_p, hid_p, nc_p = dims
    B = x.shape[0]

    vmem_cap = _vmem_capacity_bytes()
    budget = int(0.75 * vmem_cap)  # leave headroom for Mosaic internal scratch
    bm = _pick_bm(B, block_bm)
    bm, needed = _fit_bm_to_vmem(bm, in_p, hid_p, nc_p, budget)
    B_p = _round_up(B, bm)

    # Zero padding keeps semantics exact: padded hidden columns become sigmoid(0)=0.5 but
    # hit zero-padded weight rows downstream, so they contribute nothing to real outputs;
    # padded batch rows / output columns are sliced off below.
    xp = jnp.zeros((B_p, in_p), jnp.float32).at[:B, :in_sz].set(x.astype(jnp.float32))

    grid = (B_p // bm,)
    if single_buffer:
        # Constant-index weight/bias blocks: fetch once, keep a single VMEM buffer.
        const = lambda shape: pl.BlockSpec(shape, lambda i: (0, 0),
                                           pipeline_mode=pl.Buffered(1))
    else:
        const = lambda shape: pl.BlockSpec(shape, lambda i: (0, 0))

    flops = 2 * B_p * (in_p * hid_p + hid_p * hid_p + hid_p * nc_p)
    bytes_accessed = (
        xp.size * 4
        + (w1p.size + w2p.size + w3p.size) * 2
        + (b1p.size + b2p.size + b3p.size) * 4
        + B_p * nc_p * 4
    )
    cost = pl.CostEstimate(
        flops=flops, transcendentals=2 * B_p * hid_p, bytes_accessed=bytes_accessed
    )

    vmem_limit = int(min(0.9 * vmem_cap, max(1.5 * needed, 8 << 20)))

    out_p = pl.pallas_call(
        mlp_kernel,
        out_shape=jax.ShapeDtypeStruct((B_p, nc_p), jnp.float32),
        grid=grid,
        in_specs=[
            pl.BlockSpec((bm, in_p), lambda i: (i, 0)),
            const((in_p, hid_p)), const((1, hid_p)),
            const((hid_p, hid_p)), const((1, hid_p)),
            const((hid_p, nc_p)), const((1, nc_p)),
        ],
        out_specs=pl.BlockSpec((bm, nc_p), lambda i: (i, 0)),
        compiler_params=pltpu.CompilerParams(
            dimension_semantics=("parallel",),
            vmem_limit_bytes=vmem_limit,
        ),
        cost_estimate=cost,
    )(xp, w1p, b1p, w2p, b2p, w3p, b3p)

    return out_p[:B, :nc]


def mlp_net(x, prepared, *, block_bm=512):
    """Forward pass. `prepared` comes from prepare_params(params) (done once)."""
    padded, dims = prepared
    try:
        return _mlp_forward(x, padded, dims=dims, block_bm=block_bm, single_buffer=True)
    except Exception:
        # Fallback if this jax build rejects pl.Buffered(1) single-buffering.
        return _mlp_forward(x, padded, dims=dims, block_bm=block_bm, single_buffer=False)


def init_params(key, input_size, hidden_size, num_classes, dtype=jnp.float32):
    """Deterministic init mimicking nn.Linear's U(-1/sqrt(fan_in), 1/sqrt(fan_in))."""
    keys = jax.random.split(key, 6)

    def linear(kw, kb, fan_in, fan_out):
        bound = 1.0 / jnp.sqrt(jnp.array(fan_in, dtype=jnp.float32))
        # PyTorch stores weight as [out, in]; transpose to [in, out] for the kernel.
        w = jax.random.uniform(kw, (fan_out, fan_in), dtype, -bound, bound).T
        b = jax.random.uniform(kb, (1, fan_out), dtype, -bound, bound)
        return w, b

    w1, b1 = linear(keys[0], keys[1], input_size, hidden_size)
    w2, b2 = linear(keys[2], keys[3], hidden_size, hidden_size)
    w3, b3 = linear(keys[4], keys[5], hidden_size, num_classes)
    return (w1, b1, w2, b2, w3, b3)


def mlp_ref_f32(x, params):
    w1, b1, w2, b2, w3, b3 = params
    h1 = jax.nn.sigmoid(x @ w1 + b1)
    h2 = jax.nn.sigmoid(h1 @ w2 + b2)
    return h2 @ w3 + b3


def mlp_ref_bf16(x, params):
    """Reference mimicking the kernel's bf16-operand / f32-accumulate matmuls."""
    w1, b1, w2, b2, w3, b3 = params
    bf = jnp.bfloat16
    dot = lambda a, b: jnp.dot(a.astype(bf), b.astype(bf),
                               preferred_element_type=jnp.float32)
    h1 = jax.nn.sigmoid(dot(x, w1) + b1)
    h2 = jax.nn.sigmoid(dot(h1, w2) + b2)
    return dot(h2, w3) + b3


if __name__ == "__main__":
    key = jax.random.PRNGKey(0)
    k_x, k_p = jax.random.split(key)

    batch, input_size, hidden_size, num_classes = 8, 32, 32, 16
    x = jax.random.normal(k_x, (batch, input_size), dtype=jnp.float32)
    params = init_params(k_p, input_size, hidden_size, num_classes)

    # One-time weight padding / bf16 cast (hoisted out of the per-call path).
    prepared = prepare_params(params)

    out = mlp_net(x, prepared)
    out = jax.block_until_ready(out)
    assert out.shape == (batch, num_classes)

    # Tight check against a reference that uses the same bf16-operand matmuls.
    ref_q = mlp_ref_bf16(x, params)
    assert jnp.allclose(out, ref_q, atol=1e-2, rtol=1e-2), "mismatch vs bf16-emulated ref"

    # Loose sanity check against the pure-f32 reference (bf16 quantization noise).
    ref_f = mlp_ref_f32(x, params)
    assert jnp.allclose(out, ref_f, atol=5e-2, rtol=5e-2), "mismatch vs f32 ref"

    print("KERNEL_OK")
</pallas_src>

<mosaic_0001>
module attributes {stable_mosaic.version = 11 : i64} {
  func.func @mlp_kernel(%arg0: i32, %arg1: memref<8x128xf32, #tpu.memory_space<vmem>>, %arg2: memref<128x128xbf16, #tpu.memory_space<vmem>>, %arg3: memref<1x128xf32, #tpu.memory_space<vmem>>, %arg4: memref<128x128xbf16, #tpu.memory_space<vmem>>, %arg5: memref<1x128xf32, #tpu.memory_space<vmem>>, %arg6: memref<128x128xbf16, #tpu.memory_space<vmem>>, %arg7: memref<1x128xf32, #tpu.memory_space<vmem>>, %arg8: memref<8x128xf32, #tpu.memory_space<vmem>>) attributes {dimension_semantics = [#tpu.dimension_semantics<parallel>], iteration_bounds = array<i64: 1>, scalar_prefetch = 0 : i64, scratch_operands = 0 : i64, tpu.core_type = #tpu.core_type<tc>, window_params = [{transform_indices = @transform_0, window_bounds = array<i64: 8, 128>}, {pipeline_mode = #tpu.pipeline_mode<synchronous>, transform_indices = @transform_1, window_bounds = array<i64: 128, 128>}, {pipeline_mode = #tpu.pipeline_mode<synchronous>, transform_indices = @transform_2, window_bounds = array<i64: 1, 128>}, {pipeline_mode = #tpu.pipeline_mode<synchronous>, transform_indices = @transform_3, window_bounds = array<i64: 128, 128>}, {pipeline_mode = #tpu.pipeline_mode<synchronous>, transform_indices = @transform_4, window_bounds = array<i64: 1, 128>}, {pipeline_mode = #tpu.pipeline_mode<synchronous>, transform_indices = @transform_5, window_bounds = array<i64: 128, 128>}, {pipeline_mode = #tpu.pipeline_mode<synchronous>, transform_indices = @transform_6, window_bounds = array<i64: 1, 128>}, {transform_indices = @transform_7, window_bounds = array<i64: 8, 128>}]} {
    %c0 = arith.constant 0 : index
    %c0_0 = arith.constant 0 : index
    %0 = vector.load %arg1[%c0, %c0_0] : memref<8x128xf32, #tpu.memory_space<vmem>>, vector<8x128xf32>
    %1 = arith.truncf %0 : vector<8x128xf32> to vector<8x128xbf16>
    %c0_1 = arith.constant 0 : index
    %c0_2 = arith.constant 0 : index
    %2 = vector.load %arg2[%c0_1, %c0_2] : memref<128x128xbf16, #tpu.memory_space<vmem>>, vector<128x128xbf16>
    %cst = arith.constant dense<0.000000e+00> : vector<8x128xf32>
    %3 = tpu.matmul %1, %2, %cst {dimension_numbers = #tpu.dot_dimension_numbers<[1], [0], [0], [1], [0, 0, 1, 1], [], []>} : vector<8x128xbf16>, vector<128x128xbf16>, vector<8x128xf32> -> vector<8x128xf32>
    %c0_3 = arith.constant 0 : index
    %c0_4 = arith.constant 0 : index
    %4 = vector.load %arg3[%c0_3, %c0_4] : memref<1x128xf32, #tpu.memory_space<vmem>>, vector<1x128xf32>
    %5 = vector.broadcast %4 : vector<1x128xf32> to vector<8x128xf32>
    %6 = arith.addf %3, %5 : vector<8x128xf32>
    %cst_5 = arith.constant 5.000000e-01 : f32
    %7 = vector.broadcast %cst_5 : f32 to vector<8x128xf32>
    %8 = arith.mulf %7, %6 : vector<8x128xf32>
    %9 = math.tanh %8 : vector<8x128xf32>
    %cst_6 = arith.constant 1.000000e+00 : f32
    %10 = vector.broadcast %cst_6 : f32 to vector<8x128xf32>
    %11 = arith.addf %9, %10 : vector<8x128xf32>
    %cst_7 = arith.constant 5.000000e-01 : f32
    %12 = vector.broadcast %cst_7 : f32 to vector<8x128xf32>
    %13 = arith.mulf %12, %11 : vector<8x128xf32>
    %14 = arith.truncf %13 : vector<8x128xf32> to vector<8x128xbf16>
    %c0_8 = arith.constant 0 : index
    %c0_9 = arith.constant 0 : index
    %15 = vector.load %arg4[%c0_8, %c0_9] : memref<128x128xbf16, #tpu.memory_space<vmem>>, vector<128x128xbf16>
    %cst_10 = arith.constant dense<0.000000e+00> : vector<8x128xf32>
    %16 = tpu.matmul %14, %15, %cst_10 {dimension_numbers = #tpu.dot_dimension_numbers<[1], [0], [0], [1], [0, 0, 1, 1], [], []>} : vector<8x128xbf16>, vector<128x128xbf16>, vector<8x128xf32> -> vector<8x128xf32>
    %c0_11 = arith.constant 0 : index
    %c0_12 = arith.constant 0 : index
    %17 = vector.load %arg5[%c0_11, %c0_12] : memref<1x128xf32, #tpu.memory_space<vmem>>, vector<1x128xf32>
    %18 = vector.broadcast %17 : vector<1x128xf32> to vector<8x128xf32>
    %19 = arith.addf %16, %18 : vector<8x128xf32>
    %cst_13 = arith.constant 5.000000e-01 : f32
    %20 = vector.broadcast %cst_13 : f32 to vector<8x128xf32>
    %21 = arith.mulf %20, %19 : vector<8x128xf32>
    %22 = math.tanh %21 : vector<8x128xf32>
    %cst_14 = arith.constant 1.000000e+00 : f32
    %23 = vector.broadcast %cst_14 : f32 to vector<8x128xf32>
    %24 = arith.addf %22, %23 : vector<8x128xf32>
    %cst_15 = arith.constant 5.000000e-01 : f32
    %25 = vector.broadcast %cst_15 : f32 to vector<8x128xf32>
    %26 = arith.mulf %25, %24 : vector<8x128xf32>
    %27 = arith.truncf %26 : vector<8x128xf32> to vector<8x128xbf16>
    %c0_16 = arith.constant 0 : index
    %c0_17 = arith.constant 0 : index
    %28 = vector.load %arg6[%c0_16, %c0_17] : memref<128x128xbf16, #tpu.memory_space<vmem>>, vector<128x128xbf16>
    %cst_18 = arith.constant dense<0.000000e+00> : vector<8x128xf32>
    %29 = tpu.matmul %27, %28, %cst_18 {dimension_numbers = #tpu.dot_dimension_numbers<[1], [0], [0], [1], [0, 0, 1, 1], [], []>} : vector<8x128xbf16>, vector<128x128xbf16>, vector<8x128xf32> -> vector<8x128xf32>
    %c0_19 = arith.constant 0 : index
    %c0_20 = arith.constant 0 : index
    %30 = vector.load %arg7[%c0_19, %c0_20] : memref<1x128xf32, #tpu.memory_space<vmem>>, vector<1x128xf32>
    %31 = vector.broadcast %30 : vector<1x128xf32> to vector<8x128xf32>
    %32 = arith.addf %29, %31 : vector<8x128xf32>
    %c0_21 = arith.constant 0 : index
    %c0_22 = arith.constant 0 : index
    %33 = vector.load %arg8[%c0_21, %c0_22] : memref<8x128xf32, #tpu.memory_space<vmem>>, vector<8x128xf32>
    tpu.vector_store %arg8[%c0_21, %c0_22], %32 {strides = array<i32>} : memref<8x128xf32, #tpu.memory_space<vmem>>, vector<8x128xf32>,
    return
  }
  func.func @transform_0(%arg0: i32) -> (i32, i32) {
    %c0_i32 = arith.constant 0 : i32
    %c0_i32_0 = arith.constant 0 : i32
    return %arg0, %c0_i32 : i32, i32
  }
  func.func @transform_1(%arg0: i32) -> (i32, i32) {
    %c0_i32 = arith.constant 0 : i32
    %c0_i32_0 = arith.constant 0 : i32
    %c0_i32_1 = arith.constant 0 : i32
    return %c0_i32, %c0_i32_0 : i32, i32
  }
  func.func @transform_2(%arg0: i32) -> (i32, i32) {
    %c0_i32 = arith.constant 0 : i32
    %c0_i32_0 = arith.constant 0 : i32
    %c0_i32_1 = arith.constant 0 : i32
    return %c0_i32, %c0_i32_0 : i32, i32
  }
  func.func @transform_3(%arg0: i32) -> (i32, i32) {
    %c0_i32 = arith.constant 0 : i32
    %c0_i32_0 = arith.constant 0 : i32
    %c0_i32_1 = arith.constant 0 : i32
    return %c0_i32, %c0_i32_0 : i32, i32
  }
  func.func @transform_4(%arg0: i32) -> (i32, i32) {
    %c0_i32 = arith.constant 0 : i32
    %c0_i32_0 = arith.constant 0 : i32
    %c0_i32_1 = arith.constant 0 : i32
    return %c0_i32, %c0_i32_0 : i32, i32
  }
  func.func @transform_5(%arg0: i32) -> (i32, i32) {
    %c0_i32 = arith.constant 0 : i32
    %c0_i32_0 = arith.constant 0 : i32
    %c0_i32_1 = arith.constant 0 : i32
    return %c0_i32, %c0_i32_0 : i32, i32
  }
  func.func @transform_6(%arg0: i32) -> (i32, i32) {
    %c0_i32 = arith.constant 0 : i32
    %c0_i32_0 = arith.constant 0 : i32
    %c0_i32_1 = arith.constant 0 : i32
    return %c0_i32, %c0_i32_0 : i32, i32
  }
  func.func @transform_7(%arg0: i32) -> (i32, i32) {
    %c0_i32 = arith.constant 0 : i32
    %c0_i32_0 = arith.constant 0 : i32
    return %arg0, %c0_i32 : i32, i32
  }
}

module attributes {stable_mosaic.version = 11 : i64} {
  func.func @mlp_kernel(%arg0: i32, %arg1: memref<8x128xf32, #tpu.memory_space<vmem>>, %arg2: memref<128x128xbf16, #tpu.memory_space<vmem>>, %arg3: memref<1x128xf32, #tpu.memory_space<vmem>>, %arg4: memref<128x128xbf16, #tpu.memory_space<vmem>>, %arg5: memref<1x128xf32, #tpu.memory_space<vmem>>, %arg6: memref<128x128xbf16, #tpu.memory_space<vmem>>, %arg7: memref<1x128xf32, #tpu.memory_space<vmem>>, %arg8: memref<8x128xf32, #tpu.memory_space<vmem>>) attributes {dimension_semantics = [#tpu.dimension_semantics<parallel>], iteration_bounds = array<i64: 1>, scalar_prefetch = 0 : i64, scratch_operands = 0 : i64, tpu.core_type = #tpu.core_type<tc>, window_params = [{transform_indices = @transform_0, window_bounds = array<i64: 8, 128>}, {pipeline_mode = #tpu.pipeline_mode<synchronous>, transform_indices = @transform_1, window_bounds = array<i64: 128, 128>}, {pipeline_mode = #tpu.pipeline_mode<synchronous>, transform_indices = @transform_2, window_bounds = array<i64: 1, 128>}, {pipeline_mode = #tpu.pipeline_mode<synchronous>, transform_indices = @transform_3, window_bounds = array<i64: 128, 128>}, {pipeline_mode = #tpu.pipeline_mode<synchronous>, transform_indices = @transform_4, window_bounds = array<i64: 1, 128>}, {pipeline_mode = #tpu.pipeline_mode<synchronous>, transform_indices = @transform_5, window_bounds = array<i64: 128, 128>}, {pipeline_mode = #tpu.pipeline_mode<synchronous>, transform_indices = @transform_6, window_bounds = array<i64: 1, 128>}, {transform_indices = @transform_7, window_bounds = array<i64: 8, 128>}]} {
    %c0 = arith.constant 0 : index
    %c0_0 = arith.constant 0 : index
    %0 = vector.load %arg1[%c0, %c0_0] : memref<8x128xf32, #tpu.memory_space<vmem>>, vector<8x128xf32>
    %1 = arith.truncf %0 : vector<8x128xf32> to vector<8x128xbf16>
    %c0_1 = arith.constant 0 : index
    %c0_2 = arith.constant 0 : index
    %2 = vector.load %arg2[%c0_1, %c0_2] : memref<128x128xbf16, #tpu.memory_space<vmem>>, vector<128x128xbf16>
    %cst = arith.constant dense<0.000000e+00> : vector<8x128xf32>
    %3 = tpu.matmul %1, %2, %cst {dimension_numbers = #tpu.dot_dimension_numbers<[1], [0], [0], [1], [0, 0, 1, 1], [], []>} : vector<8x128xbf16>, vector<128x128xbf16>, vector<8x128xf32> -> vector<8x128xf32>
    %c0_3 = arith.constant 0 : index
    %c0_4 = arith.constant 0 : index
    %4 = vector.load %arg3[%c0_3, %c0_4] : memref<1x128xf32, #tpu.memory_space<vmem>>, vector<1x128xf32>
    %5 = vector.broadcast %4 : vector<1x128xf32> to vector<8x128xf32>
    %6 = arith.addf %3, %5 : vector<8x128xf32>
    %cst_5 = arith.constant 5.000000e-01 : f32
    %7 = vector.broadcast %cst_5 : f32 to vector<8x128xf32>
    %8 = arith.mulf %7, %6 : vector<8x128xf32>
    %9 = math.tanh %8 : vector<8x128xf32>
    %cst_6 = arith.constant 1.000000e+00 : f32
    %10 = vector.broadcast %cst_6 : f32 to vector<8x128xf32>
    %11 = arith.addf %9, %10 : vector<8x128xf32>
    %cst_7 = arith.constant 5.000000e-01 : f32
    %12 = vector.broadcast %cst_7 : f32 to vector<8x128xf32>
    %13 = arith.mulf %12, %11 : vector<8x128xf32>
    %14 = arith.truncf %13 : vector<8x128xf32> to vector<8x128xbf16>
    %c0_8 = arith.constant 0 : index
    %c0_9 = arith.constant 0 : index
    %15 = vector.load %arg4[%c0_8, %c0_9] : memref<128x128xbf16, #tpu.memory_space<vmem>>, vector<128x128xbf16>
    %cst_10 = arith.constant dense<0.000000e+00> : vector<8x128xf32>
    %16 = tpu.matmul %14, %15, %cst_10 {dimension_numbers = #tpu.dot_dimension_numbers<[1], [0], [0], [1], [0, 0, 1, 1], [], []>} : vector<8x128xbf16>, vector<128x128xbf16>, vector<8x128xf32> -> vector<8x128xf32>
    %c0_11 = arith.constant 0 : index
    %c0_12 = arith.constant 0 : index
    %17 = vector.load %arg5[%c0_11, %c0_12] : memref<1x128xf32, #tpu.memory_space<vmem>>, vector<1x128xf32>
    %18 = vector.broadcast %17 : vector<1x128xf32> to vector<8x128xf32>
    %19 = arith.addf %16, %18 : vector<8x128xf32>
    %cst_13 = arith.constant 5.000000e-01 : f32
    %20 = vector.broadcast %cst_13 : f32 to vector<8x128xf32>
    %21 = arith.mulf %20, %19 : vector<8x128xf32>
    %22 = math.tanh %21 : vector<8x128xf32>
    %cst_14 = arith.constant 1.000000e+00 : f32
    %23 = vector.broadcast %cst_14 : f32 to vector<8x128xf32>
    %24 = arith.addf %22, %23 : vector<8x128xf32>
    %cst_15 = arith.constant 5.000000e-01 : f32
    %25 = vector.broadcast %cst_15 : f32 to vector<8x128xf32>
    %26 = arith.mulf %25, %24 : vector<8x128xf32>
    %27 = arith.truncf %26 : vector<8x128xf32> to vector<8x128xbf16>
    %c0_16 = arith.constant 0 : index
    %c0_17 = arith.constant 0 : index
    %28 = vector.load %arg6[%c0_16, %c0_17] : memref<128x128xbf16, #tpu.memory_space<vmem>>, vector<128x128xbf16>
    %cst_18 = arith.constant dense<0.000000e+00> : vector<8x128xf32>
    %29 = tpu.matmul %27, %28, %cst_18 {dimension_numbers = #tpu.dot_dimension_numbers<[1], [0], [0], [1], [0, 0, 1, 1], [], []>} : vector<8x128xbf16>, vector<128x128xbf16>, vector<8x128xf32> -> vector<8x128xf32>
    %c0_19 = arith.constant 0 : index
    %c0_20 = arith.constant 0 : index
    %30 = vector.load %arg7[%c0_19, %c0_20] : memref<1x128xf32, #tpu.memory_space<vmem>>, vector<1x128xf32>
    %31 = vector.broadcast %30 : vector<1x128xf32> to vector<8x128xf32>
    %32 = arith.addf %29, %31 : vector<8x128xf32>
    %c0_21 = arith.constant 0 : index
    %c0_22 = arith.constant 0 : index
    %33 = vector.load %arg8[%c0_21, %c0_22] : memref<8x128xf32, #tpu.memory_space<vmem>>, vector<8x128xf32>
    tpu.vector_store %arg8[%c0_21, %c0_22], %32 {strides = array<i32>} : memref<8x128xf32, #tpu.memory_space<vmem>>, vector<8x128xf32>,
    return
  }
  func.func @transform_0(%arg0: i32) -> (i32, i32) {
    %c0_i32 = arith.constant 0 : i32
    %c0_i32_0 = arith.constant 0 : i32
    return %arg0, %c0_i32 : i32, i32
  }
  func.func @transform_1(%arg0: i32) -> (i32, i32) {
    %c0_i32 = arith.constant 0 : i32
    %c0_i32_0 = arith.constant 0 : i32
    %c0_i32_1 = arith.constant 0 : i32
    return %c0_i32, %c0_i32_0 : i32, i32
  }
  func.func @transform_2(%arg0: i32) -> (i32, i32) {
    %c0_i32 = arith.constant 0 : i32
    %c0_i32_0 = arith.constant 0 : i32
    %c0_i32_1 = arith.constant 0 : i32
    return %c0_i32, %c0_i32_0 : i32, i32
  }
  func.func @transform_3(%arg0: i32) -> (i32, i32) {
    %c0_i32 = arith.constant 0 : i32
    %c0_i32_0 = arith.constant 0 : i32
    %c0_i32_1 = arith.constant 0 : i32
    return %c0_i32, %c0_i32_0 : i32, i32
  }
  func.func @transform_4(%arg0: i32) -> (i32, i32) {
    %c0_i32 = arith.constant 0 : i32
    %c0_i32_0 = arith.constant 0 : i32
    %c0_i32_1 = arith.constant 0 : i32
    return %c0_i32, %c0_i32_0 : i32, i32
  }
  func.func @transform_5(%arg0: i32) -> (i32, i32) {
    %c0_i32 = arith.constant 0 : i32
    %c0_i32_0 = arith.constant 0 : i32
    %c0_i32_1 = arith.constant 0 : i32
    return %c0_i32, %c0_i32_0 : i32, i32
  }
  func.func @transform_6(%arg0: i32) -> (i32, i32) {
    %c0_i32 = arith.constant 0 : i32
    %c0_i32_0 = arith.constant 0 : i32
    %c0_i32_1 = arith.constant 0 : i32
    return %c0_i32, %c0_i32_0 : i32, i32
  }
  func.func @transform_7(%arg0: i32) -> (i32, i32) {
    %c0_i32 = arith.constant 0 : i32
    %c0_i32_0 = arith.constant 0 : i32
    return %arg0, %c0_i32 : i32, i32
  }
}

</mosaic_0001>

<bundles_post_ra>
// kernel: _mlp_forward.1
= control target key start
LH: loop header
LB: loop body
LE: loop exit
PB: predicated region body
PF: predicated region fallthrough
CT: control target
= control target key end

     0   :  { %12 = vsyncpa [#allocation3], 0  ;;  %s769_s0 = inlined_call_operand.vmem [shape: f32[8,128], index: 0, kind: input, shape index: {}]   ;;  %s770_s1 = inlined_call_operand.hbm [shape: bf16[128,128], index: 1, kind: input, shape index: {}]   ;;  %s771_s2 = inlined_call_operand.vmem [shape: f32[1,128], index: 2, kind: input, shape index: {}]   ;;  %s772_s3 = inlined_call_operand.hbm [shape: bf16[128,128], index: 3, kind: input, shape index: {}]   ;;  %s773_s4 = inlined_call_operand.vmem [shape: f32[1,128], index: 4, kind: input, shape index: {}]   ;;  %s774_s5 = inlined_call_operand.hbm [shape: bf16[128,128], index: 5, kind: input, shape index: {}]   ;;  %s775_s6 = inlined_call_operand.vmem [shape: f32[1,128], index: 6, kind: input, shape index: {}]   ;;  %s776_s7 = inlined_call_operand.hbm [shape: f32[8,128], index: 7, kind: output, shape index: {}]  }
   0x1   :  { %13 = vsyncpa [#allocation6], 0 }
   0x2   :  { %14 = vsyncpa [#allocation4], 0  ;;  %s667_s24 = smov [#allocation5]   ;;  %s668_s26 = smov [#allocation2]  }
   0x3   :  { %s36_s25 = sshll.u32 %s667_s24, 4  ;;  %s22_s27 = sshll.u32 %s668_s26, 4  ;;  %s37_s25 = int_to_ptr.vmem [resolvable:$true] %s36_s25  ;;  %s23_s27 = int_to_ptr.vmem [resolvable:$true] %s22_s27 }
   0x4   :  { %s589_s28 = scalar_lea.vmem %s37_s25, 1024  ;;  %p594_p1 = scmp.lt.s32.totalorder %s37_s25, %s37_s25 }
   0x5   :  { %p590_p0 = scmp.ne.s32.totalorder %s37_s25, %s589_s28  ;;  %p595_p2 = scmp.lt.s32.totalorder %s589_s28, %s589_s28 }
   0x7   :  { %p596_p3 = por %p595_p2, %p594_p1 }
   0x9   :  { %p597_p4 = pnand %p596_p3, %p590_p0 }
   0xb   :  { %600 = shalt.err (!%p597_p4)
}
   0xc   :  { %s669_s29 = smov 64   ;;  %s670_s30 = smov 4  }
   0xd   :  { %42 = dma.hbm_to_vmem [thread:$0]  %s772_s3, 1024, %s37_s25, [#allocation6], %s669_s29, %s669_s29, %s670_s30  }
   0xe   :  { %s609_s10 = scalar_lea.vmem %s23_s27, 1024  ;;  %p614_p6 = scmp.lt.s32.totalorder %s23_s27, %s23_s27 }
   0xf   :  { %p610_p5 = scmp.ne.s32.totalorder %s23_s27, %s609_s10  ;;  %p615_p7 = scmp.lt.s32.totalorder %s609_s10, %s609_s10 }
  0x11   :  { %p616_p8 = por %p615_p7, %p614_p6 }
  0x13   :  { %p617_p9 = pnand %p616_p8, %p610_p5 }
  0x15   :  { %620 = shalt.err (!%p617_p9)
}
  0x16   :  { %28 = dma.hbm_to_vmem [thread:$0]  %s770_s1, 1024, %s23_s27, [#allocation3], %s669_s29, %s669_s29, %s670_s30  }
  0x17   :  { %s671_s13 = smov [#allocation7]  }
  0x18   :  { %s50_s14 = sshll.u32 %s671_s13, 4  ;;  %s51_s14 = int_to_ptr.vmem [resolvable:$true] %s50_s14 }
  0x19   :  { %s629_s15 = scalar_lea.vmem %s51_s14, 1024  ;;  %p634_p11 = scmp.lt.s32.totalorder %s51_s14, %s51_s14 }
  0x1a   :  { %p630_p10 = scmp.ne.s32.totalorder %s51_s14, %s629_s15  ;;  %p635_p12 = scmp.lt.s32.totalorder %s629_s15, %s629_s15 }
  0x1c   :  { %p636_p13 = por %p635_p12, %p634_p11 }
  0x1e   :  { %p637_p0 = pnand %p636_p13, %p630_p10 }
  0x20   :  { %640 = shalt.err (!%p637_p0)
}
  0x21   :  { %56 = dma.hbm_to_vmem [thread:$0]  %s774_s5, 1024, %s51_s14, [#allocation6], %s669_s29, %s669_s29, %s670_s30  }
  0x22   :  { %661 = dma.done.wait [#allocation3], 1024  }
  0x23   :  { %662 = vsyncadd [#allocation3], 4294966272 }
  0x24   :  { %663 = dma.done.wait [#allocation6], 2048  }
  0x25   :  { %664 = vsyncadd [#allocation6], 4294965248  ;;  %v672_v0 = vmov 0.0   ;;  %vm673_vm0 = vmmov 0   ;;  %v553_v1 = vld [vmem:[#allocation2 + $0x38] sm:$0xff]   ;;  %v554_v2 = vld [vmem:[#allocation2 + $0x30] sm:$0xff]  }
  0x26   :  { %485 = vmatprep.subr.bf16.mxu0 %v672_v0  ;;  %501 = vmatprep.mubr.msk.bf16.mxu0 %vm673_vm0, %v672_v0  ;;  %v555_v3 = vld [vmem:[#allocation2 + $0x28] sm:$0xff]   ;;  %v561_v4 = vld [vmem:[#allocation5 + $0x38] sm:$0xff]   ;;  %v556_v5 = vld [vmem:[#allocation2 + $0x20] sm:$0xff]   ;;  %s674_s21 = smov [#allocation8]  }
  0x27   :  { %505 = vmatprep.subr.bf16.mxu1 %v672_v0  ;;  %521 = vmatprep.mubr.msk.bf16.mxu1 %vm673_vm0, %v672_v0  ;;  %v562_v6 = vld [vmem:[#allocation5 + $0x30] sm:$0xff]   ;;  %v557_v7 = vld [vmem:[#allocation2 + $0x18] sm:$0xff]   ;;  %v559_v9 = vld [vmem:[#allocation2 + $0x8] sm:$0xff]   ;;  %s421_s22 = sshll.u32 %s674_s21, 4  ;;  %s422_s22 = int_to_ptr.vmem [resolvable:$true] %s421_s22 }
  0x28   :  { %486 = vmatpush3.bf16.msra.mxu0 %v553_v1  ;;  %506 = vmatpush3.bf16.msra.mxu1 %v561_v4  ;;  %v558_v8 = vld [vmem:[#allocation2 + $0x10] sm:$0xff]   ;;  %v560_v10 = vld [vmem:[#allocation2] sm:$0xff]   ;;  %v563_v13 = vld [vmem:[#allocation5 + $0x28] sm:$0xff]   ;;  %p646_p2 = scmp.lt.s32.totalorder %s422_s22, %s422_s22 }
  0x29   :  { %487 = vmatprep.subr.bf16.mxu0 %v672_v0  ;;  %507 = vmatprep.subr.bf16.mxu1 %v672_v0  ;;  %v69_v11 = vld [vmem:[%s769_s0] sm:$0xff]  ;;  %v565_v15 = vld [vmem:[#allocation5 + $0x18] sm:$0xff]   ;;  %v566_v16 = vld [vmem:[#allocation5 + $0x10] sm:$0xff]  }
  0x2a   :  { %v70_v12 = vpack.c.bf16 %v69_v11, %v69_v11  ;;  %v564_v14 = vld [vmem:[#allocation5 + $0x20] sm:$0xff]   ;;  %v567_v17 = vld [vmem:[#allocation5 + $0x8] sm:$0xff]   ;;  %v569_v19 = vld [vmem:[#allocation7 + $0x38] sm:$0xff]  }
  0x2b   :  { %v568_v18 = vld [vmem:[#allocation5] sm:$0xff]   ;;  %v570_v20 = vld [vmem:[#allocation7 + $0x30] sm:$0xff]   ;;  %v571_v32 = vld [vmem:[#allocation7 + $0x28] sm:$0xff]  }
  0x2c   :  { %488 = vmatpush3.bf16.msra.mxu0 %v554_v2  ;;  %508 = vmatpush3.bf16.msra.mxu1 %v562_v6  ;;  %v431_v21 = vld [vmem:[%s771_s2] ss:$0 sm:$0xff]  ;;  %v573_v34 = vld [vmem:[#allocation7 + $0x18] sm:$0xff]   ;;  %v574_v35 = vld [vmem:[#allocation7 + $0x10] sm:$0xff]  }
  0x2d   :  { %489 = vmatprep.subr.bf16.mxu0 %v672_v0  ;;  %509 = vmatprep.subr.bf16.mxu1 %v672_v0  ;;  %v572_v33 = vld [vmem:[#allocation7 + $0x20] sm:$0xff]   ;;  %v575_v36 = vld [vmem:[#allocation7 + $0x8] sm:$0xff]  }
  0x2e   :  { %v576_v37 = vld [vmem:[#allocation7] sm:$0xff]  }
  0x2f   :  { %v440_v38 = vld [vmem:[%s773_s4] ss:$0 sm:$0xff]  ;;  %s641_s4 = scalar_lea.vmem %s422_s22, 128 }
  0x30   :  { %490 = vmatpush3.bf16.msra.mxu0 %v555_v3  ;;  %510 = vmatpush3.bf16.msra.mxu1 %v563_v13  ;;  %v449_v49 = vld [vmem:[%s775_s6] ss:$0 sm:$0xff]  ;;  %p642_p1 = scmp.ne.s32.totalorder %s422_s22, %s641_s4  ;;  %p647_p3 = scmp.lt.s32.totalorder %s641_s4, %s641_s4 }
  0x31   :  { %491 = vmatprep.subr.bf16.mxu0 %v672_v0  ;;  %511 = vmatprep.subr.bf16.mxu1 %v672_v0 }
  0x32   :  { %p648_p4 = por %p647_p3, %p646_p2 }
  0x34   :  { %492 = vmatpush3.bf16.msra.mxu0 %v556_v5  ;;  %512 = vmatpush3.bf16.msra.mxu1 %v564_v14  ;;  %p649_p5 = pnand %p648_p4, %p642_p1 }
  0x35   :  { %493 = vmatprep.subr.bf16.mxu0 %v672_v0  ;;  %513 = vmatprep.subr.bf16.mxu1 %v672_v0 }
  0x38   :  { %494 = vmatpush3.bf16.msra.mxu0 %v557_v7  ;;  %514 = vmatpush3.bf16.msra.mxu1 %v565_v15 }
  0x39   :  { %495 = vmatprep.subr.bf16.mxu0 %v672_v0  ;;  %515 = vmatprep.subr.bf16.mxu1 %v672_v0 }
  0x3c   :  { %496 = vmatpush3.bf16.msra.mxu0 %v558_v8  ;;  %516 = vmatpush3.bf16.msra.mxu1 %v566_v16 }
  0x3d   :  { %497 = vmatprep.subr.bf16.mxu0 %v672_v0  ;;  %517 = vmatprep.subr.bf16.mxu1 %v672_v0 }
  0x40   :  { %498 = vmatpush3.bf16.msra.mxu0 %v559_v9  ;;  %518 = vmatpush3.bf16.msra.mxu1 %v567_v17 }
  0x41   :  { %499 = vmatprep.subr.bf16.mxu0 %v672_v0  ;;  %519 = vmatprep.subr.bf16.mxu1 %v672_v0 }
  0x44   :  { %500 = vmatpush3.bf16.msra.mxu0 %v560_v10  ;;  %520 = vmatpush3.bf16.msra.mxu1 %v568_v18 }
  0x45   :  { %525 = vmatprep.subr.bf16.mxu0 %v672_v0 }
  0x47   :  { %502 = vmatmul.mubr.bf16.vlgmr.msra.gmra.mxu0 %v70_v12 }
  0x48   :  { %541 = vmatprep.mubr.msk.bf16.mxu0 %vm673_vm0, %v672_v0  ;;  %526 = vmatpush3.bf16.msra.mxu0 %v569_v19 }
  0x49   :  { %527 = vmatprep.subr.bf16.mxu0 %v672_v0 }
  0x4c   :  { %528 = vmatpush3.bf16.msra.mxu0 %v570_v20 }
  0x4d   :  { %529 = vmatprep.subr.bf16.mxu0 %v672_v0 }
  0x50   :  { %530 = vmatpush3.bf16.msra.mxu0 %v571_v32 }
  0x51   :  { %531 = vmatprep.subr.bf16.mxu0 %v672_v0 }
  0x54   :  { %532 = vmatpush3.bf16.msra.mxu0 %v572_v33 }
  0x55   :  { %533 = vmatprep.subr.bf16.mxu0 %v672_v0 }
  0x58   :  { %534 = vmatpush3.bf16.msra.mxu0 %v573_v34 }
  0x59   :  { %535 = vmatprep.subr.bf16.mxu0 %v672_v0 }
  0x5c   :  { %536 = vmatpush3.bf16.msra.mxu0 %v574_v35 }
  0x5d   :  { %537 = vmatprep.subr.bf16.mxu0 %v672_v0 }
  0x60   :  { %538 = vmatpush3.bf16.msra.mxu0 %v575_v36 }
  0x61   :  { %539 = vmatprep.subr.bf16.mxu0 %v672_v0 }
  0x64   :  { %540 = vmatpush3.bf16.msra.mxu0 %v576_v37 }
 0x107   :  { %v176_v22 = vpop.f32.mrf.mxu0 }
 0x108   :  { %v177_v23 = vadd.f32 %v431_v21, %v176_v22 }
 0x109   :  { %v503_v24 = vpop.f32.mrf.mxu0 }
 0x10a   :  { %v182_v25 = vmul.f32 0.5, %v177_v23 }
 0x10b   :  { %v179_v26 = vpop.f32.mrf.mxu0 }
 0x10c   :  { %577 = vtanh.f32 %v182_v25 }
 0x10d   :  { %v504_v27 = vpop.f32.mrf.mxu0 }
 0x119   :  { %v578_v28 = vpop.eup %577 }
 0x11a   :  { %v184_v29 = vadd.f32 1.0, %v578_v28 }
 0x11c   :  { %v185_v30 = vmul.f32 0.5, %v184_v29 }
 0x11e   :  { %v186_v31 = vpack.c.bf16 %v185_v30, %v185_v30 }
 0x120   :  { %522 = vmatmul.mubr.bf16.vlgmr.msra.gmra.mxu1 %v186_v31 }
 0x1e0   :  { %v292_v39 = vpop.f32.mrf.mxu1 }
 0x1e1   :  { %v293_v40 = vadd.f32 %v440_v38, %v292_v39 }
 0x1e2   :  { %v523_v41 = vpop.f32.mrf.mxu1 }
 0x1e3   :  { %v298_v42 = vmul.f32 0.5, %v293_v40 }
 0x1e4   :  { %v295_v43 = vpop.f32.mrf.mxu1 }
 0x1e5   :  { %579 = vtanh.f32 %v298_v42 }
 0x1e6   :  { %v524_v44 = vpop.f32.mrf.mxu1 }
 0x1f2   :  { %v580_v45 = vpop.eup %579 }
 0x1f3   :  { %v300_v46 = vadd.f32 1.0, %v580_v45 }
 0x1f5   :  { %v301_v47 = vmul.f32 0.5, %v300_v46 }
 0x1f7   :  { %v302_v48 = vpack.c.bf16 %v301_v47, %v301_v47 }
 0x1f9   :  { %542 = vmatmul.mubr.bf16.vlgmr.msra.gmra.mxu0 %v302_v48 }
 0x2b9   :  { %v408_v50 = vpop.f32.mrf.mxu0 }
 0x2ba   :  { %v409_v51 = vadd.f32 %v449_v49, %v408_v50 }
 0x2bb   :  { %v543_v52 = vpop.f32.mrf.mxu0 }
 0x2bc   :  { %414 = vst [vmem:[#allocation8] sm:$0xff] %v409_v51 }
 0x2bd   :  { %v411_v53 = vpop.f32.mrf.mxu0 }
 0x2be   :  { %652 = shalt.err (!%p649_p5)
}
 0x2bf   :  { %424 = dma.vmem_to_hbm [thread:$0]  %s422_s22, 128, %s776_s7, [#allocation4]   ;;  %v544_v54 = vpop.f32.mrf.mxu0 }
 0x2c0   :  { %665 = dma.done.wait [#allocation4], 128  }
 0x2c1   :  { %666 = vsyncadd [#allocation4], 4294967168 }
 0x2c2   :  { %428 = vsyncpa [#allocation3], 1 }
 0x2c3   :  { %429 = vsyncpa [#allocation6], 1 }
 0x2c4   :  { %430 = vsyncpa [#allocation4], 1 }

// kernel: _mlp_forward.1
= control target key start
LH: loop header
LB: loop body
LE: loop exit
PB: predicated region body
PF: predicated region fallthrough
CT: control target
= control target key end

     0   :  { %12 = vsyncpa [#allocation3], 0  ;;  %s769_s0 = inlined_call_operand.vmem [shape: f32[8,128], index: 0, kind: input, shape index: {}]   ;;  %s770_s1 = inlined_call_operand.hbm [shape: bf16[128,128], index: 1, kind: input, shape index: {}]   ;;  %s771_s2 = inlined_call_operand.vmem [shape: f32[1,128], index: 2, kind: input, shape index: {}]   ;;  %s772_s3 = inlined_call_operand.hbm [shape: bf16[128,128], index: 3, kind: input, shape index: {}]   ;;  %s773_s4 = inlined_call_operand.vmem [shape: f32[1,128], index: 4, kind: input, shape index: {}]   ;;  %s774_s5 = inlined_call_operand.hbm [shape: bf16[128,128], index: 5, kind: input, shape index: {}]   ;;  %s775_s6 = inlined_call_operand.vmem [shape: f32[1,128], index: 6, kind: input, shape index: {}]   ;;  %s776_s7 = inlined_call_operand.hbm [shape: f32[8,128], index: 7, kind: output, shape index: {}]  }
   0x1   :  { %13 = vsyncpa [#allocation6], 0 }
   0x2   :  { %14 = vsyncpa [#allocation4], 0  ;;  %s667_s24 = smov [#allocation5]   ;;  %s668_s26 = smov [#allocation2]  }
   0x3   :  { %s36_s25 = sshll.u32 %s667_s24, 4  ;;  %s22_s27 = sshll.u32 %s668_s26, 4  ;;  %s37_s25 = int_to_ptr.vmem [resolvable:$true] %s36_s25  ;;  %s23_s27 = int_to_ptr.vmem [resolvable:$true] %s22_s27 }
   0x4   :  { %s589_s28 = scalar_lea.vmem %s37_s25, 1024  ;;  %p594_p1 = scmp.lt.s32.totalorder %s37_s25, %s37_s25 }
   0x5   :  { %p590_p0 = scmp.ne.s32.totalorder %s37_s25, %s589_s28  ;;  %p595_p2 = scmp.lt.s32.totalorder %s589_s28, %s589_s28 }
   0x7   :  { %p596_p3 = por %p595_p2, %p594_p1 }
   0x9   :  { %p597_p4 = pnand %p596_p3, %p590_p0 }
   0xb   :  { %600 = shalt.err (!%p597_p4)
}
   0xc   :  { %s669_s29 = smov 64   ;;  %s670_s30 = smov 4  }
   0xd   :  { %42 = dma.hbm_to_vmem [thread:$0]  %s772_s3, 1024, %s37_s25, [#allocation6], %s669_s29, %s669_s29, %s670_s30  }
   0xe   :  { %s609_s10 = scalar_lea.vmem %s23_s27, 1024  ;;  %p614_p6 = scmp.lt.s32.totalorder %s23_s27, %s23_s27 }
   0xf   :  { %p610_p5 = scmp.ne.s32.totalorder %s23_s27, %s609_s10  ;;  %p615_p7 = scmp.lt.s32.totalorder %s609_s10, %s609_s10 }
  0x11   :  { %p616_p8 = por %p615_p7, %p614_p6 }
  0x13   :  { %p617_p9 = pnand %p616_p8, %p610_p5 }
  0x15   :  { %620 = shalt.err (!%p617_p9)
}
  0x16   :  { %28 = dma.hbm_to_vmem [thread:$0]  %s770_s1, 1024, %s23_s27, [#allocation3], %s669_s29, %s669_s29, %s670_s30  }
  0x17   :  { %s671_s13 = smov [#allocation7]  }
  0x18   :  { %s50_s14 = sshll.u32 %s671_s13, 4  ;;  %s51_s14 = int_to_ptr.vmem [resolvable:$true] %s50_s14 }
  0x19   :  { %s629_s15 = scalar_lea.vmem %s51_s14, 1024  ;;  %p634_p11 = scmp.lt.s32.totalorder %s51_s14, %s51_s14 }
  0x1a   :  { %p630_p10 = scmp.ne.s32.totalorder %s51_s14, %s629_s15  ;;  %p635_p12 = scmp.lt.s32.totalorder %s629_s15, %s629_s15 }
  0x1c   :  { %p636_p13 = por %p635_p12, %p634_p11 }
  0x1e   :  { %p637_p0 = pnand %p636_p13, %p630_p10 }
  0x20   :  { %640 = shalt.err (!%p637_p0)
}
  0x21   :  { %56 = dma.hbm_to_vmem [thread:$0]  %s774_s5, 1024, %s51_s14, [#allocation6], %s669_s29, %s669_s29, %s670_s30  }
  0x22   :  { %661 = dma.done.wait [#allocation3], 1024  }
  0x23   :  { %662 = vsyncadd [#allocation3], 4294966272 }
  0x24   :  { %663 = dma.done.wait [#allocation6], 2048  }
  0x25   :  { %664 = vsyncadd [#allocation6], 4294965248  ;;  %v672_v0 = vmov 0.0   ;;  %vm673_vm0 = vmmov 0   ;;  %v553_v1 = vld [vmem:[#allocation2 + $0x38] sm:$0xff]   ;;  %v554_v2 = vld [vmem:[#allocation2 + $0x30] sm:$0xff]  }
  0x26   :  { %485 = vmatprep.subr.bf16.mxu0 %v672_v0  ;;  %501 = vmatprep.mubr.msk.bf16.mxu0 %vm673_vm0, %v672_v0  ;;  %v555_v3 = vld [vmem:[#allocation2 + $0x28] sm:$0xff]   ;;  %v561_v4 = vld [vmem:[#allocation5 + $0x38] sm:$0xff]   ;;  %v556_v5 = vld [vmem:[#allocation2 + $0x20] sm:$0xff]   ;;  %s674_s21 = smov [#allocation8]  }
  0x27   :  { %505 = vmatprep.subr.bf16.mxu1 %v672_v0  ;;  %521 = vmatprep.mubr.msk.bf16.mxu1 %vm673_vm0, %v672_v0  ;;  %v562_v6 = vld [vmem:[#allocation5 + $0x30] sm:$0xff]   ;;  %v557_v7 = vld [vmem:[#allocation2 + $0x18] sm:$0xff]   ;;  %v559_v9 = vld [vmem:[#allocation2 + $0x8] sm:$0xff]   ;;  %s421_s22 = sshll.u32 %s674_s21, 4  ;;  %s422_s22 = int_to_ptr.vmem [resolvable:$true] %s421_s22 }
  0x28   :  { %486 = vmatpush3.bf16.msra.mxu0 %v553_v1  ;;  %506 = vmatpush3.bf16.msra.mxu1 %v561_v4  ;;  %v558_v8 = vld [vmem:[#allocation2 + $0x10] sm:$0xff]   ;;  %v560_v10 = vld [vmem:[#allocation2] sm:$0xff]   ;;  %v563_v13 = vld [vmem:[#allocation5 + $0x28] sm:$0xff]   ;;  %p646_p2 = scmp.lt.s32.totalorder %s422_s22, %s422_s22 }
  0x29   :  { %487 = vmatprep.subr.bf16.mxu0 %v672_v0  ;;  %507 = vmatprep.subr.bf16.mxu1 %v672_v0  ;;  %v69_v11 = vld [vmem:[%s769_s0] sm:$0xff]  ;;  %v565_v15 = vld [vmem:[#allocation5 + $0x18] sm:$0xff]   ;;  %v566_v16 = vld [vmem:[#allocation5 + $0x10] sm:$0xff]  }
  0x2a   :  { %v70_v12 = vpack.c.bf16 %v69_v11, %v69_v11  ;;  %v564_v14 = vld [vmem:[#allocation5 + $0x20] sm:$0xff]   ;;  %v567_v17 = vld [vmem:[#allocation5 + $0x8] sm:$0xff]   ;;  %v569_v19 = vld [vmem:[#allocation7 + $0x38] sm:$0xff]  }
  0x2b   :  { %v568_v18 = vld [vmem:[#allocation5] sm:$0xff]   ;;  %v570_v20 = vld [vmem:[#allocation7 + $0x30] sm:$0xff]   ;;  %v571_v32 = vld [vmem:[#allocation7 + $0x28] sm:$0xff]  }
  0x2c   :  { %488 = vmatpush3.bf16.msra.mxu0 %v554_v2  ;;  %508 = vmatpush3.bf16.msra.mxu1 %v562_v6  ;;  %v431_v21 = vld [vmem:[%s771_s2] ss:$0 sm:$0xff]  ;;  %v573_v34 = vld [vmem:[#allocation7 + $0x18] sm:$0xff]   ;;  %v574_v35 = vld [vmem:[#allocation7 + $0x10] sm:$0xff]  }
  0x2d   :  { %489 = vmatprep.subr.bf16.mxu0 %v672_v0  ;;  %509 = vmatprep.subr.bf16.mxu1 %v672_v0  ;;  %v572_v33 = vld [vmem:[#allocation7 + $0x20] sm:$0xff]   ;;  %v575_v36 = vld [vmem:[#allocation7 + $0x8] sm:$0xff]  }
  0x2e   :  { %v576_v37 = vld [vmem:[#allocation7] sm:$0xff]  }
  0x2f   :  { %v440_v38 = vld [vmem:[%s773_s4] ss:$0 sm:$0xff]  ;;  %s641_s4 = scalar_lea.vmem %s422_s22, 128 }
  0x30   :  { %490 = vmatpush3.bf16.msra.mxu0 %v555_v3  ;;  %510 = vmatpush3.bf16.msra.mxu1 %v563_v13  ;;  %v449_v49 = vld [vmem:[%s775_s6] ss:$0 sm:$0xff]  ;;  %p642_p1 = scmp.ne.s32.totalorder %s422_s22, %s641_s4  ;;  %p647_p3 = scmp.lt.s32.totalorder %s641_s4, %s641_s4 }
  0x31   :  { %491 = vmatprep.subr.bf16.mxu0 %v672_v0  ;;  %511 = vmatprep.subr.bf16.mxu1 %v672_v0 }
  0x32   :  { %p648_p4 = por %p647_p3, %p646_p2 }
  0x34   :  { %492 = vmatpush3.bf16.msra.mxu0 %v556_v5  ;;  %512 = vmatpush3.bf16.msra.mxu1 %v564_v14  ;;  %p649_p5 = pnand %p648_p4, %p642_p1 }
  0x35   :  { %493 = vmatprep.subr.bf16.mxu0 %v672_v0  ;;  %513 = vmatprep.subr.bf16.mxu1 %v672_v0 }
  0x38   :  { %494 = vmatpush3.bf16.msra.mxu0 %v557_v7  ;;  %514 = vmatpush3.bf16.msra.mxu1 %v565_v15 }
  0x39   :  { %495 = vmatprep.subr.bf16.mxu0 %v672_v0  ;;  %515 = vmatprep.subr.bf16.mxu1 %v672_v0 }
  0x3c   :  { %496 = vmatpush3.bf16.msra.mxu0 %v558_v8  ;;  %516 = vmatpush3.bf16.msra.mxu1 %v566_v16 }
  0x3d   :  { %497 = vmatprep.subr.bf16.mxu0 %v672_v0  ;;  %517 = vmatprep.subr.bf16.mxu1 %v672_v0 }
  0x40   :  { %498 = vmatpush3.bf16.msra.mxu0 %v559_v9  ;;  %518 = vmatpush3.bf16.msra.mxu1 %v567_v17 }
  0x41   :  { %499 = vmatprep.subr.bf16.mxu0 %v672_v0  ;;  %519 = vmatprep.subr.bf16.mxu1 %v672_v0 }
  0x44   :  { %500 = vmatpush3.bf16.msra.mxu0 %v560_v10  ;;  %520 = vmatpush3.bf16.msra.mxu1 %v568_v18 }
  0x45   :  { %525 = vmatprep.subr.bf16.mxu0 %v672_v0 }
  0x47   :  { %502 = vmatmul.mubr.bf16.vlgmr.msra.gmra.mxu0 %v70_v12 }
  0x48   :  { %541 = vmatprep.mubr.msk.bf16.mxu0 %vm673_vm0, %v672_v0  ;;  %526 = vmatpush3.bf16.msra.mxu0 %v569_v19 }
  0x49   :  { %527 = vmatprep.subr.bf16.mxu0 %v672_v0 }
  0x4c   :  { %528 = vmatpush3.bf16.msra.mxu0 %v570_v20 }
  0x4d   :  { %529 = vmatprep.subr.bf16.mxu0 %v672_v0 }
  0x50   :  { %530 = vmatpush3.bf16.msra.mxu0 %v571_v32 }
  0x51   :  { %531 = vmatprep.subr.bf16.mxu0 %v672_v0 }
  0x54   :  { %532 = vmatpush3.bf16.msra.mxu0 %v572_v33 }
  0x55   :  { %533 = vmatprep.subr.bf16.mxu0 %v672_v0 }
  0x58   :  { %534 = vmatpush3.bf16.msra.mxu0 %v573_v34 }
  0x59   :  { %535 = vmatprep.subr.bf16.mxu0 %v672_v0 }
  0x5c   :  { %536 = vmatpush3.bf16.msra.mxu0 %v574_v35 }
  0x5d   :  { %537 = vmatprep.subr.bf16.mxu0 %v672_v0 }
  0x60   :  { %538 = vmatpush3.bf16.msra.mxu0 %v575_v36 }
  0x61   :  { %539 = vmatprep.subr.bf16.mxu0 %v672_v0 }
  0x64   :  { %540 = vmatpush3.bf16.msra.mxu0 %v576_v37 }
 0x107   :  { %v176_v22 = vpop.f32.mrf.mxu0 }
 0x108   :  { %v177_v23 = vadd.f32 %v431_v21, %v176_v22 }
 0x109   :  { %v503_v24 = vpop.f32.mrf.mxu0 }
 0x10a   :  { %v182_v25 = vmul.f32 0.5, %v177_v23 }
 0x10b   :  { %v179_v26 = vpop.f32.mrf.mxu0 }
 0x10c   :  { %577 = vtanh.f32 %v182_v25 }
 0x10d   :  { %v504_v27 = vpop.f32.mrf.mxu0 }
 0x119   :  { %v578_v28 = vpop.eup %577 }
 0x11a   :  { %v184_v29 = vadd.f32 1.0, %v578_v28 }
 0x11c   :  { %v185_v30 = vmul.f32 0.5, %v184_v29 }
 0x11e   :  { %v186_v31 = vpack.c.bf16 %v185_v30, %v185_v30 }
 0x120   :  { %522 = vmatmul.mubr.bf16.vlgmr.msra.gmra.mxu1 %v186_v31 }
 0x1e0   :  { %v292_v39 = vpop.f32.mrf.mxu1 }
 0x1e1   :  { %v293_v40 = vadd.f32 %v440_v38, %v292_v39 }
 0x1e2   :  { %v523_v41 = vpop.f32.mrf.mxu1 }
 0x1e3   :  { %v298_v42 = vmul.f32 0.5, %v293_v40 }
 0x1e4   :  { %v295_v43 = vpop.f32.mrf.mxu1 }
 0x1e5   :  { %579 = vtanh.f32 %v298_v42 }
 0x1e6   :  { %v524_v44 = vpop.f32.mrf.mxu1 }
 0x1f2   :  { %v580_v45 = vpop.eup %579 }
 0x1f3   :  { %v300_v46 = vadd.f32 1.0, %v580_v45 }
 0x1f5   :  { %v301_v47 = vmul.f32 0.5, %v300_v46 }
 0x1f7   :  { %v302_v48 = vpack.c.bf16 %v301_v47, %v301_v47 }
 0x1f9   :  { %542 = vmatmul.mubr.bf16.vlgmr.msra.gmra.mxu0 %v302_v48 }
 0x2b9   :  { %v408_v50 = vpop.f32.mrf.mxu0 }
 0x2ba   :  { %v409_v51 = vadd.f32 %v449_v49, %v408_v50 }
 0x2bb   :  { %v543_v52 = vpop.f32.mrf.mxu0 }
 0x2bc   :  { %414 = vst [vmem:[#allocation8] sm:$0xff] %v409_v51 }
 0x2bd   :  { %v411_v53 = vpop.f32.mrf.mxu0 }
 0x2be   :  { %652 = shalt.err (!%p649_p5)
}
 0x2bf   :  { %424 = dma.vmem_to_hbm [thread:$0]  %s422_s22, 128, %s776_s7, [#allocation4]   ;;  %v544_v54 = vpop.f32.mrf.mxu0 }
 0x2c0   :  { %665 = dma.done.wait [#allocation4], 128  }
 0x2c1   :  { %666 = vsyncadd [#allocation4], 4294967168 }
 0x2c2   :  { %428 = vsyncpa [#allocation3], 1 }
 0x2c3   :  { %429 = vsyncpa [#allocation6], 1 }
 0x2c4   :  { %430 = vsyncpa [#allocation4], 1 }

</bundles_post_ra>
